<compile_context>
chip_gen: v7x
topology: tpu7x:2x2x1
jax: 0.10.0
libtpu: 0.0.40
codegen_flags: <defaults>
</compile_context>

<pallas_src>
import jax
import jax.numpy as jnp
from jax.experimental import pallas as pl
from jax.experimental.pallas import tpu as pltpu


_LANE_CANDIDATES = (1024, 512, 256, 128)   # any multiple of 128 is lane-dense
_TARGET_TILE_BYTES = 2 * 1024 * 1024       # 2 MiB per buffer -> 8 MiB total
_MIN_KERNEL_ELEMS = 64 * 1024              # below this, plain XLA is faster
_MIN_GRID = 4                              # keep both v7x TCs streaming


def _round_up(x, m):
    return ((x + m - 1) // m) * m


def _sublane_multiple(dtype):
    # second-to-last block dim must be a multiple of 8/16/32 for 4/2/1-byte dtypes
    itemsize = jnp.dtype(dtype).itemsize
    return {4: 8, 2: 16, 1: 32}.get(itemsize, 8)


def _bias_kernel(alpha_ref, beta_ref, x_ref, o_ref):
    # alpha/beta: (1,) f32 scalars in SMEM; x_ref/o_ref: (tile_r, lane) VMEM tiles.
    a = alpha_ref[0]
    b = beta_ref[0]
    y = a * x_ref[...].astype(jnp.float32) + b
    o_ref[...] = y.astype(o_ref.dtype)


def bias_layer_forward(x, alpha, beta, *,
                       min_kernel_elems=_MIN_KERNEL_ELEMS,
                       donate_input=False):
    """y = alpha * x + beta (alpha, beta are 1-element learned parameters)."""
    orig_shape = x.shape
    orig_dtype = x.dtype
    total = x.size
    itemsize = jnp.dtype(orig_dtype).itemsize

    # Parameters handled in f32 (matches PyTorch fp32 parameters). Reject
    # mis-shaped parameters instead of silently truncating.
    a32 = jnp.asarray(alpha, dtype=jnp.float32)
    b32 = jnp.asarray(beta, dtype=jnp.float32)
    if a32.size != 1 or b32.size != 1:
        raise ValueError("alpha and beta must each have exactly one element")
    a32 = a32.reshape(1)
    b32 = b32.reshape(1)

    def _xla_affine(v):
        y = a32[0] * v.astype(jnp.float32) + b32[0]
        return y.astype(orig_dtype).reshape(orig_shape)

    # Largest lane-dense width that divides the element count (no pad copy).
    lane = None
    for cand in _LANE_CANDIDATES:
        if total > 0 and total % cand == 0:
            lane = cand
            break

    # Tiny tensors, or element counts not a multiple of 128: plain XLA fused
    # FMA is also HBM-roofline-bound and avoids any pad/concat copies.
    if total < min_kernel_elems or lane is None:
        return _xla_affine(x)

    rows = total // lane
    sub = _sublane_multiple(orig_dtype)

    # Byte-based tile: ~2 MiB per buffer regardless of dtype.
    tile_r = _round_up(max(1, _TARGET_TILE_BYTES // (lane * itemsize)), sub)
    # Keep the grid >= _MIN_GRID when there is enough work so the "parallel"
    # axis splits across both v7x TensorCores.
    if rows >= _MIN_GRID * sub:
        tile_r = min(tile_r, max(sub, _round_up(pl.cdiv(rows, _MIN_GRID), sub)))
    if tile_r >= rows:
        tile_r = rows        # one full block; block dim == array dim is legal

    grid = (pl.cdiv(rows, tile_r),)   # partial last block is masked by Pallas

    x2d = x.reshape(rows, lane)       # contiguous reshape, no data movement

    out2d = pl.pallas_call(
        _bias_kernel,
        out_shape=jax.ShapeDtypeStruct((rows, lane), orig_dtype),
        grid=grid,
        in_specs=[
            pl.BlockSpec(memory_space=pltpu.SMEM),            # alpha (f32 scalar)
            pl.BlockSpec(memory_space=pltpu.SMEM),            # beta  (f32 scalar)
            pl.BlockSpec((tile_r, lane), lambda i: (i, 0)),    # x tile
        ],
        out_specs=pl.BlockSpec((tile_r, lane), lambda i: (i, 0)),
        compiler_params=pltpu.CompilerParams(
            dimension_semantics=("parallel",)),                # shard across TCs
        cost_estimate=pl.CostEstimate(
            flops=2 * total,
            transcendentals=0,
            bytes_accessed=2 * total * itemsize + 8),
        input_output_aliases=({2: 0} if donate_input else {}),
    )(a32, b32, x2d)

    return out2d.reshape(orig_shape)


if __name__ == "__main__":
    key = jax.random.PRNGKey(0)
    k1, k2, k3 = jax.random.split(key, 3)

    # Deterministic parameters (BiasLayer init is alpha=1, beta=0; perturbed
    # so the affine is non-trivial).
    alpha = jnp.ones((1,), dtype=jnp.float32) * 1.5
    beta = jnp.zeros((1,), dtype=jnp.float32) + 0.25

    # 1) Small NCHW example (as in the spec), forced through the Pallas kernel
    #    (lane=1024, rows=2, single full block, no padding anywhere).
    x_small = jax.random.normal(k1, (2, 4, 16, 16), dtype=jnp.float32)
    y_small = jax.block_until_ready(
        bias_layer_forward(x_small, alpha, beta, min_kernel_elems=0))
    ref_small = alpha[0] * x_small + beta[0]
    assert y_small.shape == x_small.shape
    assert jnp.allclose(y_small, ref_small, atol=1e-6, rtol=1e-6)

    # 2) Same input through the default path (tiny-tensor XLA fallback).
    y_fb = jax.block_until_ready(bias_layer_forward(x_small, alpha, beta))
    assert jnp.allclose(y_fb, ref_small, atol=1e-6, rtol=1e-6)

    # 3) Larger tensor: multi-step pipelined grid (grid=(4,)), no padding.
    x_big = jax.random.normal(k2, (8, 16, 64, 128), dtype=jnp.float32)
    y_big = jax.block_until_ready(bias_layer_forward(x_big, alpha, beta))
    ref_big = alpha[0] * x_big + beta[0]
    assert y_big.shape == x_big.shape
    assert jnp.allclose(y_big, ref_big, atol=1e-6, rtol=1e-6)

    # 4) Ragged row count (rows=40, tile_r=16): exercises the masked partial
    #    last block — no jnp.pad, no output slice.
    x_rag = jax.random.normal(k3, (1, 40, 1024), dtype=jnp.float32)
    y_rag = jax.block_until_ready(
        bias_layer_forward(x_rag, alpha, beta, min_kernel_elems=0))
    ref_rag = alpha[0] * x_rag + beta[0]
    assert jnp.allclose(y_rag, ref_rag, atol=1e-6, rtol=1e-6)

    # 5) bf16 input: f32 SMEM scalars, f32 compute, cast-on-store; byte-based
    #    tile keeps the grid-step count independent of dtype.
    x_bf16 = x_small.astype(jnp.bfloat16)
    y_bf16 = jax.block_until_ready(
        bias_layer_forward(x_bf16, alpha, beta, min_kernel_elems=0))
    ref_bf16 = (alpha[0] * x_bf16.astype(jnp.float32) + beta[0]).astype(jnp.bfloat16)
    assert y_bf16.dtype == jnp.bfloat16
    assert jnp.allclose(y_bf16.astype(jnp.float32),
                        ref_bf16.astype(jnp.float32), atol=1e-2, rtol=1e-2)

    # 6) Element count not a multiple of 128 -> full XLA fallback path
    #    (no pad copy is ever issued).
    x_odd = jax.random.normal(k1, (3, 5, 7), dtype=jnp.float32)
    y_odd = jax.block_until_ready(
        bias_layer_forward(x_odd, alpha, beta, min_kernel_elems=0))
    assert jnp.allclose(y_odd, alpha[0] * x_odd + beta[0], atol=1e-6, rtol=1e-6)

    print("KERNEL_OK")
</pallas_src>

<mosaic_0001>
module attributes {stable_mosaic.version = 11 : i64} {
  func.func @_bias_kernel(%arg0: i32, %arg1: memref<1xf32, #tpu.memory_space<smem>>, %arg2: memref<1xf32, #tpu.memory_space<smem>>, %arg3: memref<2x1024xf32, #tpu.memory_space<vmem>>, %arg4: memref<2x1024xf32, #tpu.memory_space<vmem>>) attributes {dimension_semantics = [#tpu.dimension_semantics<parallel>], iteration_bounds = array<i64: 1>, scalar_prefetch = 0 : i64, scratch_operands = 0 : i64, tpu.core_type = #tpu.core_type<tc>, window_params = [{transform_indices = @transform_0, window_bounds = array<i64: 1>}, {transform_indices = @transform_1, window_bounds = array<i64: 1>}, {transform_indices = @transform_2, window_bounds = array<i64: 2, 1024>}, {transform_indices = @transform_3, window_bounds = array<i64: 2, 1024>}]} {
    %c0 = arith.constant 0 : index
    %0 = memref.load %arg1[%c0] : memref<1xf32, #tpu.memory_space<smem>>
    %c0_0 = arith.constant 0 : index
    %1 = memref.load %arg2[%c0_0] : memref<1xf32, #tpu.memory_space<smem>>
    %c0_1 = arith.constant 0 : index
    %c0_2 = arith.constant 0 : index
    %2 = vector.load %arg3[%c0_1, %c0_2] : memref<2x1024xf32, #tpu.memory_space<vmem>>, vector<2x1024xf32>
    %3 = vector.broadcast %0 : f32 to vector<2x1024xf32>
    %4 = arith.mulf %3, %2 : vector<2x1024xf32>
    %5 = vector.broadcast %1 : f32 to vector<2x1024xf32>
    %6 = arith.addf %4, %5 : vector<2x1024xf32>
    %c0_3 = arith.constant 0 : index
    %c0_4 = arith.constant 0 : index
    %7 = vector.load %arg4[%c0_3, %c0_4] : memref<2x1024xf32, #tpu.memory_space<vmem>>, vector<2x1024xf32>
    tpu.vector_store %arg4[%c0_3, %c0_4], %6 {strides = array<i32>} : memref<2x1024xf32, #tpu.memory_space<vmem>>, vector<2x1024xf32>,
    return
  }
  func.func @transform_0(%arg0: i32) -> i32 {
    %c0_i32 = arith.constant 0 : i32
    %c0_i32_0 = arith.constant 0 : i32
    return %c0_i32 : i32
  }
  func.func @transform_1(%arg0: i32) -> i32 {
    %c0_i32 = arith.constant 0 : i32
    %c0_i32_0 = arith.constant 0 : i32
    return %c0_i32 : i32
  }
  func.func @transform_2(%arg0: i32) -> (i32, i32) {
    %c0_i32 = arith.constant 0 : i32
    %c0_i32_0 = arith.constant 0 : i32
    return %arg0, %c0_i32 : i32, i32
  }
  func.func @transform_3(%arg0: i32) -> (i32, i32) {
    %c0_i32 = arith.constant 0 : i32
    %c0_i32_0 = arith.constant 0 : i32
    return %arg0, %c0_i32 : i32, i32
  }
}

</mosaic_0001>

<bundles_post_ra>
// kernel: tpu_custom_call.1
= control target key start
LH: loop header
LB: loop body
LE: loop exit
PB: predicated region body
PF: predicated region fallthrough
CT: control target
= control target key end

     0   :  { %10 = vsyncpa [#allocation5], 0  ;;  %s158_s0 = inlined_call_operand.<no memory space> [shape: f32[1], index: 0, kind: input, shape index: {}]   ;;  %s159_s1 = inlined_call_operand.<no memory space> [shape: f32[1], index: 1, kind: input, shape index: {}]   ;;  %s160_s2 = inlined_call_operand.hbm [shape: f32[2,1024], index: 2, kind: input, shape index: {}]   ;;  %s161_s3 = inlined_call_operand.hbm [shape: f32[2,1024], index: 3, kind: output, shape index: {}]  }
   0x1   :  { %11 = vsyncpa [#allocation6], 0  ;;  %s106_s12 = smov [#allocation4]   ;;  %s58_s16 = scalar_lea.hbm %s160_s2, 256 }
   0x2   :  { %s22_s13 = sshll.u32 %s106_s12, 4  ;;  %p59_p0 = scmp.ne.s32.totalorder %s160_s2, %s58_s16  ;;  %s23_s13 = int_to_ptr.vmem [resolvable:$true] %s22_s13 }
   0x3   :  { %p62_p1 = scmp.lt.u32.totalorder %s58_s16, %s160_s2 }
   0x5   :  { %p64_p2 = pnand %p62_p1, %p59_p0 }
   0x7   :  { %67 = shalt.err (!%p64_p2)
}
   0x8   :  { %s68_s21 = scalar_lea.vmem %s23_s13, 256  ;;  %p73_p4 = scmp.lt.s32.totalorder %s23_s13, %s23_s13 }
   0x9   :  { %p69_p3 = scmp.ne.s32.totalorder %s23_s13, %s68_s21  ;;  %p74_p5 = scmp.lt.s32.totalorder %s68_s21, %s68_s21 }
   0xb   :  { %p75_p6 = por %p74_p5, %p73_p4 }
   0xd   :  { %p76_p7 = pnand %p75_p6, %p69_p3 }
   0xf   :  { %79 = shalt.err (!%p76_p7)
}
  0x10   :  { %25 = dma.hbm_to_vmem [thread:$0]  %s160_s2, 256, %s23_s13, [#allocation5]  }
  0x11   :  { %102 = dma.done.wait [#allocation5], 256  }
  0x12   :  { %103 = vsyncadd [#allocation5], 4294967040  ;;  %v33_v0 = vstv %s158_s0  ;;  %v31_v1 = vld [vmem:[#allocation4] sm:$0xff]  ;;  %v36_v2 = vstv %s159_s1  ;;  %v32_v3 = vld [vmem:[#allocation4 + $0x8] sm:$0xff]  ;;  %s107_s28 = smov [#allocation7]  }
  0x13   :  { %s47_s29 = sshll.u32 %s107_s28, 4  ;;  %v34_v4 = vmul.f32 %v33_v0, %v31_v1  ;;  %v35_v5 = vmul.f32 %v33_v0, %v32_v3  ;;  %s48_s29 = int_to_ptr.vmem [resolvable:$true] %s47_s29 }
  0x14   :  { %s80_s2 = scalar_lea.vmem %s48_s29, 256  ;;  %p85_p9 = scmp.lt.s32.totalorder %s48_s29, %s48_s29 }
  0x15   :  { %v37_v6 = vadd.f32 %v36_v2, %v34_v4  ;;  %v38_v7 = vadd.f32 %v36_v2, %v35_v5  ;;  %p81_p8 = scmp.ne.s32.totalorder %s48_s29, %s80_s2  ;;  %p86_p10 = scmp.lt.s32.totalorder %s80_s2, %s80_s2 }
  0x17   :  { %39 = vst [vmem:[#allocation7] sm:$0xff] %v37_v6  ;;  %40 = vst [vmem:[#allocation7 + $0x8] sm:$0xff] %v38_v7  ;;  %p87_p11 = por %p86_p10, %p85_p9 }
  0x19   :  { %p88_p12 = pnand %p87_p11, %p81_p8 }
  0x1b   :  { %91 = shalt.err (!%p88_p12)
}
  0x1c   :  { %s92_s1 = scalar_lea.hbm %s161_s3, 256 }
  0x1d   :  { %p93_p13 = scmp.ne.s32.totalorder %s161_s3, %s92_s1  ;;  %p96_p0 = scmp.lt.u32.totalorder %s92_s1, %s161_s3 }
  0x1f   :  { %p98_p1 = pnand %p96_p0, %p93_p13 }
  0x21   :  { %101 = shalt.err (!%p98_p1)
}
  0x22   :  { %50 = dma.vmem_to_hbm [thread:$0]  %s48_s29, 256, %s161_s3, [#allocation6]  }
  0x23   :  { %104 = dma.done.wait [#allocation6], 256  }
  0x24   :  { %105 = vsyncadd [#allocation6], 4294967040 }
  0x25   :  { %54 = vsyncpa [#allocation5], 1 }
  0x26   :  { %55 = vsyncpa [#allocation6], 1 }

</bundles_post_ra>
